<compile_context>
chip_gen: v7x
topology: tpu7x:2x2x1
jax: 0.10.0
libtpu: 0.0.40
codegen_flags: <defaults>
</compile_context>

<pallas_src>
import functools
import math

import jax
import jax.numpy as jnp
from jax.experimental import pallas as pl
from jax.experimental.pallas import tpu as pltpu


# ---------------------------------------------------------------------------
# Fused linear kernel:  act(x @ w + b)   (BN already folded into w / b)
# Covers: 1x1 conv + BN2d + SiLU, QKV / output projections, head Linears.
# ---------------------------------------------------------------------------
def _linear_kernel(x_ref, w_ref, b_ref, o_ref, *, act):
    # x_ref / w_ref are bf16 -> single-pass MXU matmul with f32 accumulation.
    y = jnp.dot(x_ref[...], w_ref[...], preferred_element_type=jnp.float32)
    y = y + b_ref[...]
    if act == "silu":
        y = y * jax.nn.sigmoid(y)
    elif act == "relu":
        y = jnp.maximum(y, 0.0)
    o_ref[...] = y.astype(o_ref.dtype)


def _pick_tm(rows, block_rows):
    """Row-tile size: several grid steps for pipelining/megacore, sublane-aligned."""
    if rows <= 8:
        return rows                       # single full block (full-dim exception)
    target = pl.cdiv(rows, 8)             # aim for ~8 grid steps
    tm = ((target + 7) // 8) * 8          # round up to sublane multiple
    return max(8, min(tm, block_rows))


def linear_act(x, w, b=None, act="none", out_dtype=jnp.float32, block_rows=1024):
    rows, cin = x.shape
    cout = w.shape[1]
    x = x.astype(jnp.bfloat16)
    w = w.astype(jnp.bfloat16)
    if b is None:
        b = jnp.zeros((cout,), jnp.float32)
    b = b.reshape(1, cout).astype(jnp.float32)

    tm = _pick_tm(rows, block_rows)
    grid = (pl.cdiv(rows, tm),)           # ragged edge handled by Pallas (no host pad)

    out_bytes = jnp.dtype(out_dtype).itemsize
    # double-buffered activation/output tiles + resident bf16 weight + bias
    blk_bytes = 2 * (2 * tm * cin) + 2 * (cin * cout) + 4 * cout + out_bytes * (2 * tm * cout)
    vmem_limit = int(min(max(4 << 20, 4 * blk_bytes), 48 << 20))   # stay below v7x 64 MiB

    return pl.pallas_call(
        functools.partial(_linear_kernel, act=act),
        out_shape=jax.ShapeDtypeStruct((rows, cout), out_dtype),
        grid=grid,
        in_specs=[
            pl.BlockSpec((tm, cin), lambda i: (i, 0)),
            pl.BlockSpec((cin, cout), lambda i: (0, 0)),
            pl.BlockSpec((1, cout), lambda i: (0, 0)),
        ],
        out_specs=pl.BlockSpec((tm, cout), lambda i: (i, 0)),
        compiler_params=pltpu.CompilerParams(
            dimension_semantics=("parallel",),
            vmem_limit_bytes=vmem_limit,
        ),
        cost_estimate=pl.CostEstimate(
            flops=2 * rows * cin * cout,
            transcendentals=rows * cout if act == "silu" else 0,
            bytes_accessed=2 * rows * cin + 2 * cin * cout + 4 * cout + out_bytes * rows * cout,
        ),
    )(x, w, b)


# ---------------------------------------------------------------------------
# Attention core: one batch element per grid step, heads batched on a leading
# axis (batched dot_general -> no lane-misaligned per-head slicing).
#   q, k, v : (B, nh, Lp, hd) bf16  ->  out : (B, nh, Lp, hd) bf16
# ---------------------------------------------------------------------------
def _attn_kernel(q_ref, k_ref, v_ref, o_ref, *, true_len):
    q = q_ref[0]                                           # (nh, Lp, hd) bf16
    k = k_ref[0]
    v = v_ref[0]
    nh, Lp, hd = q.shape
    s = jax.lax.dot_general(                               # (nh, Lp, Lp) f32
        q, k, dimension_numbers=(((2,), (2,)), ((0,), (0,))),
        preferred_element_type=jnp.float32)
    s = s * (1.0 / math.sqrt(hd))
    if Lp != true_len:                                     # mask padded key columns
        col = jax.lax.broadcasted_iota(jnp.int32, (nh, Lp, Lp), 2)
        s = jnp.where(col < true_len, s, -jnp.inf)
    s = s - jnp.max(s, axis=-1, keepdims=True)
    p = jnp.exp(s)
    denom = jnp.sum(p, axis=-1, keepdims=True)
    p = p * pl.reciprocal(denom, approx=True)              # EUP, frees VALU slots
    o = jax.lax.dot_general(                               # (nh, Lp, hd) f32
        p.astype(v.dtype), v,
        dimension_numbers=(((2,), (1,)), ((0,), (0,))),
        preferred_element_type=jnp.float32)
    o_ref[0] = o.astype(o_ref.dtype)


def attention_core(q, k, v, true_len):
    B, nh, Lp, hd = q.shape
    qkv_blk = nh * Lp * hd * 2
    blk_bytes = 2 * (3 * qkv_blk) + 2 * qkv_blk + 2 * nh * Lp * Lp * 4
    vmem_limit = int(min(max(4 << 20, 2 * blk_bytes), 48 << 20))
    return pl.pallas_call(
        functools.partial(_attn_kernel, true_len=true_len),
        out_shape=jax.ShapeDtypeStruct((B, nh, Lp, hd), jnp.bfloat16),
        grid=(B,),
        in_specs=[pl.BlockSpec((1, nh, Lp, hd), lambda b: (b, 0, 0, 0))] * 3,
        out_specs=pl.BlockSpec((1, nh, Lp, hd), lambda b: (b, 0, 0, 0)),
        compiler_params=pltpu.CompilerParams(
            dimension_semantics=("parallel",),
            vmem_limit_bytes=vmem_limit,
        ),
        cost_estimate=pl.CostEstimate(
            flops=B * nh * 4 * Lp * Lp * hd,
            transcendentals=B * nh * Lp * Lp,
            bytes_accessed=2 * 4 * B * nh * Lp * hd,
        ),
    )(q, k, v)


# ---------------------------------------------------------------------------
# Fused orthogonal-fusion + both average pools, one batch element per step.
#   local map (B, HW, C) bf16, global map (B, HWg, C) bf16  ->  pooled (B, 2C) f32
# pooled = [ g , mean(local) - <mean(local), g^> g^ ],  g = mean(global map)
# (equivalent to pooling the concatenated fused map of the original module).
# ---------------------------------------------------------------------------
def _fuse_pool_kernel(l_ref, g_ref, o_ref):
    l = l_ref[0].astype(jnp.float32)                       # (HW, C)
    gm = g_ref[0].astype(jnp.float32)                      # (HWg, C)
    c = l.shape[-1]
    g = jnp.mean(gm, axis=0, keepdims=True)                # (1, C)
    ml = jnp.mean(l, axis=0, keepdims=True)                # (1, C)
    gnorm = jnp.sqrt(jnp.sum(g * g)) + 1e-6
    gu = g / gnorm
    coeff = jnp.sum(ml * gu)
    orth = ml - coeff * gu
    o_ref[:, :c] = g.astype(o_ref.dtype)
    o_ref[:, c:] = orth.astype(o_ref.dtype)


def orth_fuse_pool(local_map, global_map):
    B, HW, C = local_map.shape
    _, HWg, _ = global_map.shape
    return pl.pallas_call(
        _fuse_pool_kernel,
        out_shape=jax.ShapeDtypeStruct((B, 2 * C), jnp.float32),
        grid=(B,),
        in_specs=[
            pl.BlockSpec((1, HW, C), lambda b: (b, 0, 0)),
            pl.BlockSpec((1, HWg, C), lambda b: (b, 0, 0)),
        ],
        out_specs=pl.BlockSpec((1, 2 * C), lambda b: (b, 0)),
        compiler_params=pltpu.CompilerParams(dimension_semantics=("parallel",)),
    )(local_map, global_map)


# ---------------------------------------------------------------------------
# Host-side BN folding helpers
# ---------------------------------------------------------------------------
def fold_bn(w, gamma, beta, mean, var, eps, bias=None):
    scale = gamma / jnp.sqrt(var + eps)
    w_f = w * scale[None, :]
    b_f = beta - mean * scale
    if bias is not None:
        b_f = bias * scale + b_f
    return w_f, b_f


# ---------------------------------------------------------------------------
# Full forward
# ---------------------------------------------------------------------------
def mlg_forward(params, local_feat_map, global_feat_map):
    B, C_li, H, W = local_feat_map.shape
    _, C_gi, Hg, Wg = global_feat_map.shape
    nh = params["num_heads"]
    D = params["w_lc"].shape[1]
    assert D % nh == 0, "embed dim must be divisible by num_heads"
    hd = D // nh
    L = H * W

    # ---- local branch: 1x1 conv + folded BN + SiLU -------------------------
    x_loc = jnp.transpose(local_feat_map, (0, 2, 3, 1)).reshape(B * L, C_li)
    w_lc, b_lc = fold_bn(params["w_lc"], params["lc_gamma"], params["lc_beta"],
                         params["lc_mean"], params["lc_var"], 1e-3)
    lf = linear_act(x_loc, w_lc, b_lc, act="silu", out_dtype=jnp.bfloat16)      # (B*L, D)

    # ---- multi-head self-attention -----------------------------------------
    # QKV projection hoisted into the row-tiled matmul path.
    qkv = linear_act(lf, params["w_qkv"], params["b_qkv"],
                     act="none", out_dtype=jnp.bfloat16)                        # (B*L, 3D)
    qkv = qkv.reshape(B, L, 3, nh, hd)
    q = jnp.transpose(qkv[:, :, 0], (0, 2, 1, 3))                               # (B, nh, L, hd)
    k = jnp.transpose(qkv[:, :, 1], (0, 2, 1, 3))
    v = jnp.transpose(qkv[:, :, 2], (0, 2, 1, 3))
    Lp = ((L + 7) // 8) * 8                                                     # pad once to sublane mult
    if Lp != L:
        padc = lambda a: jnp.pad(a, ((0, 0), (0, 0), (0, Lp - L), (0, 0)))
        q, k, v = padc(q), padc(k), padc(v)
    attn = attention_core(q, k, v, true_len=L)                                  # (B, nh, Lp, hd)
    attn = jnp.transpose(attn, (0, 2, 1, 3)).reshape(B, Lp, D)[:, :L, :]
    lf = linear_act(attn.reshape(B * L, D), params["w_o"], params["b_o"],
                    act="none", out_dtype=jnp.bfloat16).reshape(B, L, D)        # (B, L, D)

    # ---- global branch: 1x1 conv + folded BN + SiLU -------------------------
    x_glb = jnp.transpose(global_feat_map, (0, 2, 3, 1)).reshape(B * Hg * Wg, C_gi)
    w_gc, b_gc = fold_bn(params["w_gc"], params["gc_gamma"], params["gc_beta"],
                         params["gc_mean"], params["gc_var"], 1e-3)
    gf_map = linear_act(x_glb, w_gc, b_gc, act="silu",
                        out_dtype=jnp.bfloat16).reshape(B, Hg * Wg, D)          # (B, HWg, D)

    # ---- fused orthogonal fusion + both average pools -----------------------
    # C_global == C_local (both D) so OrthogonalFusion's lazy projector is unused,
    # exactly like the original model (1280 == 1280).
    pooled = orth_fuse_pool(lf, gf_map)                                         # (B, 2D) f32

    # ---- head: Linear -> Linear + folded BN1d + ReLU ------------------------
    h = linear_act(pooled, params["w_h1"], params["b_h1"],
                   act="none", out_dtype=jnp.bfloat16)
    w_h2, b_h2 = fold_bn(params["w_h2"], params["hbn_gamma"], params["hbn_beta"],
                         params["hbn_mean"], params["hbn_var"], 1e-5,
                         bias=params["b_h2"])
    emb = linear_act(h, w_h2, b_h2, act="relu", out_dtype=jnp.float32)
    return emb


# ---------------------------------------------------------------------------
# Pure-JAX f32 reference (same math) for a sanity check
# ---------------------------------------------------------------------------
def mlg_forward_reference(params, local_feat_map, global_feat_map):
    d = params["w_lc"].shape[1]
    nh = params["num_heads"]
    hd = d // nh

    def conv_bn_silu(x, w, gamma, beta, mean, var, eps):
        B, C, H, W = x.shape
        xf = jnp.transpose(x, (0, 2, 3, 1)).reshape(B, H * W, C)
        y = xf @ w
        scale = gamma / jnp.sqrt(var + eps)
        y = y * scale + (beta - mean * scale)
        return y * jax.nn.sigmoid(y)

    lf = conv_bn_silu(local_feat_map, params["w_lc"], params["lc_gamma"],
                      params["lc_beta"], params["lc_mean"], params["lc_var"], 1e-3)
    B, L, _ = lf.shape
    qkv = lf @ params["w_qkv"] + params["b_qkv"]
    q, k, v = qkv[..., :d], qkv[..., d:2 * d], qkv[..., 2 * d:]
    q = q.reshape(B, L, nh, hd)
    k = k.reshape(B, L, nh, hd)
    v = v.reshape(B, L, nh, hd)
    s = jnp.einsum("blhd,bmhd->bhlm", q, k) / math.sqrt(hd)
    p = jax.nn.softmax(s, axis=-1)
    a = jnp.einsum("bhlm,bmhd->blhd", p, v).reshape(B, L, d)
    lf = a @ params["w_o"] + params["b_o"]

    gf = conv_bn_silu(global_feat_map, params["w_gc"], params["gc_gamma"],
                      params["gc_beta"], params["gc_mean"], params["gc_var"], 1e-3)
    gf = gf.mean(axis=1)

    gnorm = jnp.sqrt(jnp.sum(gf * gf, axis=1, keepdims=True)) + 1e-6
    gu = gf / gnorm
    coeff = jnp.einsum("bld,bd->bl", lf, gu)
    orth = lf - coeff[..., None] * gu[:, None, :]
    gmap = jnp.broadcast_to(gf[:, None, :], orth.shape)
    fused = jnp.concatenate([gmap, orth], axis=-1)

    pooled = fused.mean(axis=1)
    h = pooled @ params["w_h1"] + params["b_h1"]
    h = h @ params["w_h2"] + params["b_h2"]
    bn_scale = params["hbn_gamma"] / jnp.sqrt(params["hbn_var"] + 1e-5)
    h = h * bn_scale + (params["hbn_beta"] - params["hbn_mean"] * bn_scale)
    return jnp.maximum(h, 0.0)


def init_params(key, c_local_in, c_global_in, d, num_heads, emb):
    ks = jax.random.split(key, 12)

    def nrm(k, shape, fan_in):
        return jax.random.normal(k, shape, jnp.float32) / math.sqrt(fan_in)

    p = {"num_heads": num_heads}
    p["w_lc"] = nrm(ks[0], (c_local_in, d), c_local_in)
    p["lc_gamma"] = 1.0 + 0.1 * jax.random.normal(ks[1], (d,), jnp.float32)
    p["lc_beta"] = 0.1 * jax.random.normal(ks[2], (d,), jnp.float32)
    p["lc_mean"] = jnp.zeros((d,), jnp.float32)
    p["lc_var"] = jnp.ones((d,), jnp.float32)
    p["w_qkv"] = nrm(ks[3], (d, 3 * d), d)
    p["b_qkv"] = jnp.zeros((3 * d,), jnp.float32)
    p["w_o"] = nrm(ks[4], (d, d), d)
    p["b_o"] = jnp.zeros((d,), jnp.float32)
    p["w_gc"] = nrm(ks[5], (c_global_in, d), c_global_in)
    p["gc_gamma"] = 1.0 + 0.1 * jax.random.normal(ks[6], (d,), jnp.float32)
    p["gc_beta"] = 0.1 * jax.random.normal(ks[7], (d,), jnp.float32)
    p["gc_mean"] = jnp.zeros((d,), jnp.float32)
    p["gc_var"] = jnp.ones((d,), jnp.float32)
    p["w_h1"] = nrm(ks[8], (2 * d, emb), 2 * d)
    p["b_h1"] = 0.01 * jax.random.normal(ks[9], (emb,), jnp.float32)
    p["w_h2"] = nrm(ks[10], (emb, emb), emb)
    p["b_h2"] = 0.01 * jax.random.normal(ks[11], (emb,), jnp.float32)
    p["hbn_gamma"] = jnp.ones((emb,), jnp.float32)
    p["hbn_beta"] = jnp.zeros((emb,), jnp.float32)
    p["hbn_mean"] = jnp.zeros((emb,), jnp.float32)
    p["hbn_var"] = jnp.ones((emb,), jnp.float32)
    return p


if __name__ == "__main__":
    key = jax.random.PRNGKey(0)
    k_loc, k_glob, k_par = jax.random.split(key, 3)

    # Small shapes consistent with the module (scaled down from 160ch@14x14 /
    # 256ch@7x7 backbone features and 1280-wide branches / 8 attention heads).
    B = 2
    C_LOCAL_IN, H, W = 24, 8, 8          # backbone features[-2]
    C_GLOBAL_IN, HG, WG = 32, 4, 4       # backbone features[-1]
    D = 128                              # branch width (1280 in the original)
    NUM_HEADS = 8
    EMB = 128                            # embedding_size

    local_feat_map = jax.random.normal(k_loc, (B, C_LOCAL_IN, H, W), jnp.float32)
    global_feat_map = jax.random.normal(k_glob, (B, C_GLOBAL_IN, HG, WG), jnp.float32)

    params = init_params(k_par, C_LOCAL_IN, C_GLOBAL_IN, D, NUM_HEADS, EMB)

    emb = mlg_forward(params, local_feat_map, global_feat_map)
    emb = jax.block_until_ready(emb)
    assert emb.shape == (B, EMB), emb.shape

    ref = mlg_forward_reference(params, local_feat_map, global_feat_map)
    max_err = float(jnp.max(jnp.abs(emb - ref)))
    # bf16 weights/activations at the MXU + bf16 inter-kernel handoffs -> looser
    # tolerance than the all-f32 reference.
    assert jnp.allclose(emb, ref, rtol=5e-2, atol=5e-2), max_err

    print("KERNEL_OK")
</pallas_src>

<mosaic_0001>
module attributes {stable_mosaic.version = 11 : i64} {
  func.func @_linear_kernel(%arg0: i32, %arg1: memref<16x24xbf16, #tpu.memory_space<vmem>>, %arg2: memref<24x128xbf16, #tpu.memory_space<vmem>>, %arg3: memref<1x128xf32, #tpu.memory_space<vmem>>, %arg4: memref<16x128xbf16, #tpu.memory_space<vmem>>) attributes {dimension_semantics = [#tpu.dimension_semantics<parallel>], iteration_bounds = array<i64: 8>, scalar_prefetch = 0 : i64, scratch_operands = 0 : i64, tpu.core_type = #tpu.core_type<tc>, window_params = [{transform_indices = @transform_0, window_bounds = array<i64: 16, 24>}, {pipeline_mode = #tpu.pipeline_mode<synchronous>, transform_indices = @transform_1, window_bounds = array<i64: 24, 128>}, {pipeline_mode = #tpu.pipeline_mode<synchronous>, transform_indices = @transform_2, window_bounds = array<i64: 1, 128>}, {transform_indices = @transform_3, window_bounds = array<i64: 16, 128>}]} {
    %c0 = arith.constant 0 : index
    %c0_0 = arith.constant 0 : index
    %0 = vector.load %arg1[%c0, %c0_0] : memref<16x24xbf16, #tpu.memory_space<vmem>>, vector<16x24xbf16>
    %c0_1 = arith.constant 0 : index
    %c0_2 = arith.constant 0 : index
    %1 = vector.load %arg2[%c0_1, %c0_2] : memref<24x128xbf16, #tpu.memory_space<vmem>>, vector<24x128xbf16>
    %cst = arith.constant dense<0.000000e+00> : vector<16x128xf32>
    %2 = tpu.matmul %0, %1, %cst {dimension_numbers = #tpu.dot_dimension_numbers<[1], [0], [0], [1], [0, 0, 1, 1], [], []>} : vector<16x24xbf16>, vector<24x128xbf16>, vector<16x128xf32> -> vector<16x128xf32>
    %c0_3 = arith.constant 0 : index
    %c0_4 = arith.constant 0 : index
    %3 = vector.load %arg3[%c0_3, %c0_4] : memref<1x128xf32, #tpu.memory_space<vmem>>, vector<1x128xf32>
    %4 = vector.broadcast %3 : vector<1x128xf32> to vector<16x128xf32>
    %5 = arith.addf %2, %4 : vector<16x128xf32>
    %6 = arith.negf %5 : vector<16x128xf32>
    %7 = math.exp %6 : vector<16x128xf32>
    %cst_5 = arith.constant 1.000000e+00 : f32
    %8 = vector.broadcast %cst_5 : f32 to vector<16x128xf32>
    %9 = arith.addf %8, %7 : vector<16x128xf32>
    %10 = arith.divf %8, %9 : vector<16x128xf32>
    %11 = arith.mulf %5, %10 : vector<16x128xf32>
    %12 = arith.truncf %11 : vector<16x128xf32> to vector<16x128xbf16>
    %c0_6 = arith.constant 0 : index
    %c0_7 = arith.constant 0 : index
    %13 = vector.load %arg4[%c0_6, %c0_7] : memref<16x128xbf16, #tpu.memory_space<vmem>>, vector<16x128xbf16>
    tpu.vector_store %arg4[%c0_6, %c0_7], %12 {strides = array<i32>} : memref<16x128xbf16, #tpu.memory_space<vmem>>, vector<16x128xbf16>,
    return
  }
  func.func @transform_0(%arg0: i32) -> (i32, i32) {
    %c0_i32 = arith.constant 0 : i32
    %c0_i32_0 = arith.constant 0 : i32
    return %arg0, %c0_i32 : i32, i32
  }
  func.func @transform_1(%arg0: i32) -> (i32, i32) {
    %c0_i32 = arith.constant 0 : i32
    %c0_i32_0 = arith.constant 0 : i32
    %c0_i32_1 = arith.constant 0 : i32
    return %c0_i32, %c0_i32_0 : i32, i32
  }
  func.func @transform_2(%arg0: i32) -> (i32, i32) {
    %c0_i32 = arith.constant 0 : i32
    %c0_i32_0 = arith.constant 0 : i32
    %c0_i32_1 = arith.constant 0 : i32
    return %c0_i32, %c0_i32_0 : i32, i32
  }
  func.func @transform_3(%arg0: i32) -> (i32, i32) {
    %c0_i32 = arith.constant 0 : i32
    %c0_i32_0 = arith.constant 0 : i32
    return %arg0, %c0_i32 : i32, i32
  }
}

</mosaic_0001>

<bundles_post_ra>
// kernel: tpu_custom_call.1
= control target key start
LH: loop header
LB: loop body
LE: loop exit
PB: predicated region body
PF: predicated region fallthrough
CT: control target
= control target key end

     0   :  { %8 = vsyncpa [#allocation3], 0  ;;  %s642_s0 = inlined_call_operand.vmem [shape: bf16[128,24], index: 0, kind: input, shape index: {}]   ;;  %s643_s1 = inlined_call_operand.vmem [shape: bf16[24,128], index: 1, kind: input, shape index: {}]   ;;  %s644_s2 = inlined_call_operand.vmem [shape: f32[1,128], index: 2, kind: input, shape index: {}]   ;;  %s645_s3 = inlined_call_operand.hbm [shape: bf16[128,128], index: 3, kind: output, shape index: {}]  }
   0x1   :  { %10 = vsyncpa [#allocation3 + $0x1], 0  ;;  %s531_s12 = smov 0   ;;  %s533_s13 = smov 0  }
   0x2   :  { %s535_s14 = smov 0   ;;  %s537_s15 = smov 0  }
   0x3 LB: > { %s552_s16 = sadd.s32 4294967295, %s504_s15   ;;  %s348_s17 = sadd.s32 4294967294, %s504_s15   ;;  %s504_s15 = sphi %s537_s15, %s651_s15   ;;  %s500_s14 = sphi %s535_s14, %s650_s14   ;;  %s496_s13 = sphi %s533_s13, %s649_s13   ;;  %s492_s12 = sphi %s531_s12, %s648_s12  }
   0x4   : > { %s556_s18 = sadd.s32 1, %s504_s15   ;;  %s91_s19 = sadd.s32 1, %s500_s14 }
   0x5   : > { %s88_s20 = ssub.s32 %s504_s15, %s556_s18  ;;  %p101_p0 = scmp.ne.s32.totalorder %s500_s14, %s496_s13 }
   0x6   : > { %p89_p1 = scmp.eq.s32.totalorder %s88_s20, 0  ;;  %p102_p2 = scmp.eq.s32.totalorder %s552_s16, 7 }
   0x7   : > { %p107_p3 = scmp.ne.s32.totalorder %s496_s13, %s492_s12  ;;  %p108_p4 = scmp.eq.s32.totalorder %s348_s17, 7 }
   0x8   : > { %s567_s21 = scalar_select %p89_p1, %s500_s14, %s91_s19  }
   0x9   : > { %p569_p5 = por %p102_p2, %p101_p0  ;;  %p573_p6 = por %p108_p4, %p107_p3 }
   0xa   : > { %p351_p7 = scmp.ge.s32.totalorder %s504_s15, 1  ;;  %p141_p8 = scmp.lt.s32.totalorder %s504_s15, 9 }
   0xc   : > { %p142_p9 = pnand %p351_p7, %p141_p8 }
   0xd   : > { %v431_v0 = vld [vmem:[%s643_s1] sm:$0xff] (!%p142_p9)   ;;  %v506_v1 = vmov (!%p142_p9), 0.0   ;;  %v432_v2 = vld [vmem:[%s643_s1 + $0x8] ss:$0 sps:$4 sm:$0xff] (!%p142_p9)   ;;  %vm203_vm0 = vcmask (!%p142_p9), 1043456   ;;  %vm507_vm1 = vmmov (!%p142_p9), 0  }
   0xe   : > { %145 = sbr.rel (%p142_p9) target bundleno = 286 (0x11e), region = 32  ;;  %380 = vmatprep.subr.bf16.mxu0 (!%p142_p9), %v506_v1  ;;  %384 = vmatprep.mubr.msk.bf16.mxu0 (!%p142_p9), %vm507_vm1, %v506_v1  ;;  %s353_s28 = sshll.u32 (!%p142_p9), %s552_s16, 1  ;;  %v205_v3 = vsel (!%p142_p9), %vm203_vm0, %v432_v2, 0  ;;  %vm199_vm2 = vcmask (!%p142_p9), 195584   ;;  %v355_v5 = vld [vmem:[%s644_s2] ss:$0 sm:$0xff] (!%p142_p9) }
   0xf   : > { %381 = vmatpush3.bf16.msra.mxu0 (!%p142_p9), %v431_v0  ;;  %p166_p10 = scmp.lt.s32.totalorder (!%p142_p9), %s353_s28, 15  ;;  %s162_s8 = sand.u32 (!%p142_p9), 1, %s496_s13  }
  0x10   : > { %382 = vmatprep.subr.bf16.mxu0 (!%p142_p9), %v506_v1  ;;  %s352_s9 = sshll.u32 (!%p142_p9), %s162_s8, 3  ;;  %s371_s17 = sshll.u32 (!%p142_p9), %s552_s16, 7 }
  0x11   : > { %s164_s10 = scalar_lea.vmem (!%p142_p9), [#allocation2], %s352_s9  ;;  %s597_s24 = scalar_lea.hbm (!%p142_p9), %s645_s3, %s371_s17 }
  0x12   : > { %s286_s11 = sshll.u32 (!%p142_p9), %s164_s10, 4  ;;  %s601_s25 = scalar_lea.sflag (!%p142_p9), [#allocation3], %s162_s8  ;;  %s599_s11 = int_to_ptr.vmem [resolvable:$true] %s286_s11 }
  0x13   : > { %383 = vmatpush3.bf16.msra.mxu0 (!%p142_p9), %v205_v3  ;;  %s442_s26 = scalar_lea.vmem (!%p142_p9), %s599_s11, 128  ;;  %s508_s16 = smov (!%p142_p9), [#allocation2]  }
  0x14   : > { %p443_p11 = scmp.ne.s32.totalorder (!%p142_p9), %s599_s11, %s442_s26  ;;  %s446_s27 = sshll.u32 (!%p142_p9), %s508_s16, 4  ;;  %s447_s27 = int_to_ptr.vmem [resolvable:$false] %s446_s27 }
  0x15   : > { %s653_s28 = smov (!%p166_p10, %s353_s28), 15  ;;  %p449_p0 = scmp.lt.s32.totalorder %s599_s11, %s447_s27 }
  0x16   : > { %s354_s29 = sshll.u32 %s653_s28, 2  ;;  %p444_p12 = pnand %p443_p11, %p569_p5 }
  0x17   : > { %s169_s5 = scalar_lea.vmem %s642_s0, %s354_s29  ;;  %s448_s28 = scalar_lea.vmem %s447_s27, 256 }
  0x18   : > { %v433_v4 = vld [vmem:[%s169_s5] sm:$0xff]   ;;  %p445_p13 = pneg %p444_p12  ;;  %p450_p1 = scmp.lt.s32.totalorder %s448_s28, %s442_s26 }
  0x19   : > { %385 = vmatmul.mubr.msk.bf16.vlgmr.msra.gmra.mrb[0].mxu0 %vm199_vm2, %v433_v4 }
  0x1a   : > { %p451_p2 = por %p450_p1, %p449_p0 }
  0x1c   : > { %p452_p3 = pnand %p451_p2, %p445_p13 }
  0xec   : > { %v241_v6 = vpop.f32.mrb[0].mxu0 }
  0xed   : > { %v242_v7 = vadd.f32 %v355_v5, %v241_v6  ;;  %v386_v8 = vpop.f32.mrb[1].mxu0 }
  0xee   : > { %v244_v9 = vpop.f32.mrb[2].mxu0 }
  0xef   : > { %v360_v10 = vmul.f32 -1.442695, %v242_v7  ;;  %v245_v11 = vadd.f32 %v355_v5, %v244_v9  ;;  %v387_v12 = vpop.f32.mrb[3].mxu0 }
  0xf1   : > { %434 = vpow2.f32 %v360_v10  ;;  %v361_v13 = vmul.f32 -1.442695, %v245_v11 }
  0xf3   : > { %436 = vpow2.f32 %v361_v13 }
  0xfb   : > { %v435_v14 = vpop.eup %434 }
  0xfc   : > { %v254_v15 = vadd.f32 1.0, %v435_v14 }
  0xfd   : > { %v437_v16 = vpop.eup %436 }
  0xfe   : > { %438 = vrcp.f32 %v254_v15  ;;  %v255_v17 = vadd.f32 1.0, %v437_v16 }
 0x100   : > { %440 = vrcp.f32 %v255_v17 }
 0x108   : > { %v439_v18 = vpop.eup %438 }
 0x109   : > { %v260_v20 = vmul.f32 %v439_v18, %v242_v7 }
 0x10a   : > { %v441_v19 = vpop.eup %440 }
 0x10b   : > { %v261_v21 = vmul.f32 %v441_v19, %v245_v11 }
 0x10d   : > { %v375_v22 = vpack.c.bf16 %v261_v21, %v260_v20 }
 0x10f   : > { %376 = vst [vmem:[%s164_s10] sm:$0xff] %v375_v22  }
 0x110   : > { %455 = shalt.err (!%p452_p3)
}
 0x111   : > { %s456_s29 = scalar_lea.hbm %s597_s24, 128  ;;  %s460_s5 = scalar_lea.hbm %s645_s3, 1024 }
 0x112   : > { %p457_p4 = scmp.ne.s32.totalorder %s597_s24, %s456_s29  ;;  %p461_p9 = scmp.lt.u32.totalorder %s597_s24, %s645_s3 }
 0x113   : > { %p462_p10 = scmp.lt.u32.totalorder %s460_s5, %s456_s29  ;;  %p464_p12 = scmp.lt.u32.totalorder %s456_s29, %s597_s24 }
 0x114   : > { %p458_p7 = pnand %p457_p4, %p569_p5 }
 0x115   : > { %p463_p11 = por %p462_p10, %p461_p9 }
 0x116   : > { %p459_p8 = pneg %p458_p7 }
 0x117   : > { %p465_p13 = por %p464_p12, %p463_p11 }
 0x119   : > { %p466_p0 = pnand %p465_p13, %p459_p8 }
 0x11b   : > { %469 = shalt.err (!%p466_p0)
}
 0x11c   : > { %s509_s8 = smov 64   ;;  %s510_s9 = smov 4  }
 0x11d   : > { %388 = dma.vmem_to_hbm [thread:$0]  (%p569_p5), %s599_s11, 128, %s597_s24, %s601_s25, %s509_s8, %s509_s8, %s510_s9  }
 0x11e PF: > { %p394_p1 = scmp.ge.s32.totalorder %s504_s15, 2  ;;  %s301_s10 = sand.u32 1, %s492_s12  }
 0x11f   : > { %s302_s17 = scalar_lea.sflag [#allocation3], %s301_s10 }
 0x120   : > { %p391_p2 = pnand %p394_p1, %p573_p6 }
 0x122   : > { %487 = dma.done.wait (!%p391_p2), %s302_s17, 128  }
 0x123   : > { %489 = vsyncadd (!%p391_p2), %s302_s17, 4294967168  ;;  %p13_p3 = scmp.ge.s32.totalorder %s556_s18, 10   ;;  %s648_s12 = smov %s496_s13 }
 0x124   : > { %s649_s13 = smov %s500_s14  ;;  %s650_s14 = smov %s567_s21 }
 0x125   : > { %s651_s15 = smov %s556_s18  ;;  %15 = sbr.rel (!%p13_p3) target bundleno = 3 (0x3), region = 67 }
 0x12c   :  { %307 = vsyncpa [#allocation3], 1 }
 0x12d   :  { %309 = vsyncpa [#allocation3 + $0x1], 1 }

</bundles_post_ra>
